<compile_context>
chip_gen: v7x
topology: tpu7x:2x2x1
jax: 0.10.0
libtpu: 0.0.40
codegen_flags: <defaults>
</compile_context>

<pallas_src>
import functools

import jax
import jax.numpy as jnp
from jax import lax
from jax.experimental import pallas as pl
from jax.experimental.pallas import tpu as pltpu


def _self_attention_kernel(x_ref, w_ref, o_ref, *,
                           num_heads, head_dim, causal_mask, q_chunk):
    """One batch element per grid step.

    x_ref: (1, t, k) VMEM  input slab (native dtype)
    w_ref: (k, 3k)   VMEM  pre-transposed [Wq*scale | Wk | Wv]
    o_ref: (1, t, k) VMEM  output slab
    """
    t = x_ref.shape[1]
    k = x_ref.shape[2]
    d = head_dim

    x = x_ref[0]                                                   # (t, k)

    # Fused Q|K|V projection: one large MXU matmul, f32 accumulation.
    qkv = jnp.dot(x, w_ref[...], preferred_element_type=jnp.float32)  # (t, 3k)
    # Keep attention matmul operands in the compute dtype (bf16 fast path if
    # the caller passes bf16; stays f32 for f32 inputs).
    qkv = qkv.astype(x.dtype)
    q = qkv[:, :k]          # 1/sqrt(d) already folded into Wq by the wrapper
    kk = qkv[:, k:2 * k]
    v = qkv[:, 2 * k:]

    head_outs = []
    for hh in range(num_heads):
        lo = hh * d
        qh = q[:, lo:lo + d]                                       # (t, d)
        kh = kk[:, lo:lo + d]                                      # (t, d)
        vh = v[:, lo:lo + d]                                       # (t, d)

        chunk_outs = []
        for start in range(0, t, q_chunk):
            cs = min(q_chunk, t - start)
            qc = qh[start:start + cs, :]                           # (cs, d)

            # (cs, t) logits; contract the last dims directly (no explicit .T).
            logits = lax.dot_general(
                qc, kh, (((1,), (1,)), ((), ())),
                preferred_element_type=jnp.float32)

            if causal_mask:
                row = start + lax.broadcasted_iota(jnp.int32, (cs, t), 0)
                col = lax.broadcasted_iota(jnp.int32, (cs, t), 1)
                # Large finite negative instead of -inf (NaN-safe for padded rows).
                logits = jnp.where(col > row, jnp.float32(-1e30), logits)

            # Numerically stable softmax with deferred normalization.
            m = jnp.max(logits, axis=-1, keepdims=True)
            p = jnp.exp(logits - m)
            s = jnp.sum(p, axis=-1, keepdims=True)                 # (cs, 1)
            o = jnp.dot(p.astype(vh.dtype), vh,
                        preferred_element_type=jnp.float32)        # (cs, d)
            o = o * pl.reciprocal(s, approx=True)                  # EUP reciprocal
            chunk_outs.append(o)

        out_h = (chunk_outs[0] if len(chunk_outs) == 1
                 else jnp.concatenate(chunk_outs, axis=0))         # (t, d)
        head_outs.append(out_h)

    out = (head_outs[0] if num_heads == 1
           else jnp.concatenate(head_outs, axis=-1))               # (t, k)
    # Single lane-dense full-width store.
    o_ref[0] = out.astype(o_ref.dtype)


def self_attention_pallas(x, wq, wk, wv, num_heads, mask=False, q_chunk=256):
    b, t, k = x.shape
    assert k % num_heads == 0
    head_dim = k // num_heads
    scale = float(head_dim) ** -0.5

    # Wrapper-side layout plumbing (free): pre-transpose, fold the logit scale
    # into Wq, and fuse the three projections into one (k, 3k) weight.
    w_cat = jnp.concatenate(
        [(wq * scale).T, wk.T, wv.T], axis=1).astype(x.dtype)       # (k, 3k)

    tq = min(q_chunk, t)

    kernel = functools.partial(
        _self_attention_kernel,
        num_heads=num_heads,
        head_dim=head_dim,
        causal_mask=mask,
        q_chunk=tq,
    )

    return pl.pallas_call(
        kernel,
        out_shape=jax.ShapeDtypeStruct((b, t, k), x.dtype),
        grid_spec=pltpu.PrefetchScalarGridSpec(
            num_scalar_prefetch=0,
            grid=(b,),
            in_specs=[
                pl.BlockSpec((1, t, k), lambda bi: (bi, 0, 0)),     # x slab
                pl.BlockSpec((k, 3 * k), lambda bi: (0, 0)),        # fused weights
            ],
            out_specs=pl.BlockSpec((1, t, k), lambda bi: (bi, 0, 0)),
        ),
        compiler_params=pltpu.CompilerParams(
            dimension_semantics=("parallel",),
            vmem_limit_bytes=64 * 1024 * 1024,
        ),
    )(x, w_cat)


def self_attention_reference(x, wq, wk, wv, num_heads, mask=False):
    """Pure-JAX reference mirroring the PyTorch forward exactly."""
    b, t, k = x.shape
    h = num_heads
    d = k // h
    keys = jnp.einsum('btk,ok->bto', x, wk).reshape(b, t, h, d)
    queries = jnp.einsum('btk,ok->bto', x, wq).reshape(b, t, h, d)
    values = jnp.einsum('btk,ok->bto', x, wv).reshape(b, t, h, d)
    keys = keys.transpose(0, 2, 1, 3).reshape(b * h, t, d)
    queries = queries.transpose(0, 2, 1, 3).reshape(b * h, t, d)
    values = values.transpose(0, 2, 1, 3).reshape(b * h, t, d)
    scale = d ** 0.25
    queries = queries / scale
    keys = keys / scale
    dot = jnp.einsum('bqd,bkd->bqk', queries, keys)
    if mask:
        m = jnp.triu(jnp.ones((t, t), dtype=bool), k=1)
        dot = jnp.where(m[None], -jnp.inf, dot)
    dot = jax.nn.softmax(dot, axis=2)
    s_att = jnp.einsum('bqk,bkd->bqd', dot, values).reshape(b, h, t, d)
    return s_att.transpose(0, 2, 1, 3).reshape(b, t, k)


if __name__ == "__main__":
    # Small shapes consistent with the module: (b, t, k) with k % heads == 0.
    b, t, k = 2, 8, 32
    num_heads = 4

    key = jax.random.PRNGKey(0)
    kx, kq, kk, kv = jax.random.split(key, 4)
    x = jax.random.normal(kx, (b, t, k), dtype=jnp.float32)
    # nn.Linear weight shape: (out, in) = (k, k).
    wq = jax.random.normal(kq, (k, k), dtype=jnp.float32) * (1.0 / k ** 0.5)
    wk = jax.random.normal(kk, (k, k), dtype=jnp.float32) * (1.0 / k ** 0.5)
    wv = jax.random.normal(kv, (k, k), dtype=jnp.float32) * (1.0 / k ** 0.5)

    for mask in (False, True):
        out = self_attention_pallas(x, wq, wk, wv, num_heads, mask=mask)
        out = jax.block_until_ready(out)
        ref = self_attention_reference(x, wq, wk, wv, num_heads, mask=mask)
        assert out.shape == (b, t, k)
        # Tolerance accounts for the EUP approximate reciprocal used in the
        # deferred softmax normalization (error << 1e-3 relative).
        assert jnp.allclose(out, ref, atol=2e-3, rtol=2e-3), (
            f"mismatch (mask={mask}): max err "
            f"{float(jnp.max(jnp.abs(out - ref)))}"
        )

    print("KERNEL_OK")
</pallas_src>

<mosaic_0001>
module attributes {stable_mosaic.version = 11 : i64} {
  func.func @_self_attention_kernel(%arg0: i32, %arg1: memref<1x8x32xf32, #tpu.memory_space<vmem>>, %arg2: memref<32x96xf32, #tpu.memory_space<vmem>>, %arg3: memref<1x8x32xf32, #tpu.memory_space<vmem>>) attributes {dimension_semantics = [#tpu.dimension_semantics<parallel>], iteration_bounds = array<i64: 2>, scalar_prefetch = 0 : i64, scratch_operands = 0 : i64, tpu.core_type = #tpu.core_type<tc>, window_params = [{transform_indices = @transform_0, window_bounds = array<i64: 1, 8, 32>}, {pipeline_mode = #tpu.pipeline_mode<synchronous>, transform_indices = @transform_1, window_bounds = array<i64: 32, 96>}, {transform_indices = @transform_2, window_bounds = array<i64: 1, 8, 32>}]} {
    %c0 = arith.constant 0 : index
    %c0_0 = arith.constant 0 : index
    %c0_1 = arith.constant 0 : index
    %0 = vector.load %arg1[%c0, %c0_0, %c0_1] : memref<1x8x32xf32, #tpu.memory_space<vmem>>, vector<1x8x32xf32>
    %1 = vector.shape_cast %0 : vector<1x8x32xf32> to vector<8x32xf32>
    %c0_2 = arith.constant 0 : index
    %c0_3 = arith.constant 0 : index
    %2 = vector.load %arg2[%c0_2, %c0_3] : memref<32x96xf32, #tpu.memory_space<vmem>>, vector<32x96xf32>
    %cst = arith.constant dense<0.000000e+00> : vector<8x96xf32>
    %3 = tpu.matmul %1, %2, %cst {dimension_numbers = #tpu.dot_dimension_numbers<[1], [0], [0], [1], [0, 0, 1, 1], [], []>} : vector<8x32xf32>, vector<32x96xf32>, vector<8x96xf32> -> vector<8x96xf32>
    %4 = vector.extract_strided_slice %3 {offsets = [0, 0], sizes = [8, 32], strides = [1, 1]} : vector<8x96xf32> to vector<8x32xf32>
    %5 = vector.extract_strided_slice %3 {offsets = [0, 32], sizes = [8, 32], strides = [1, 1]} : vector<8x96xf32> to vector<8x32xf32>
    %6 = vector.extract_strided_slice %3 {offsets = [0, 64], sizes = [8, 32], strides = [1, 1]} : vector<8x96xf32> to vector<8x32xf32>
    %7 = vector.extract_strided_slice %4 {offsets = [0, 0], sizes = [8, 8], strides = [1, 1]} : vector<8x32xf32> to vector<8x8xf32>
    %8 = vector.extract_strided_slice %5 {offsets = [0, 0], sizes = [8, 8], strides = [1, 1]} : vector<8x32xf32> to vector<8x8xf32>
    %9 = vector.extract_strided_slice %6 {offsets = [0, 0], sizes = [8, 8], strides = [1, 1]} : vector<8x32xf32> to vector<8x8xf32>
    %cst_4 = arith.constant dense<0.000000e+00> : vector<8x8xf32>
    %10 = tpu.matmul %7, %8, %cst_4 {dimension_numbers = #tpu.dot_dimension_numbers<[1], [1], [0], [0], [0, 0, 1, 0], [], []>} : vector<8x8xf32>, vector<8x8xf32>, vector<8x8xf32> -> vector<8x8xf32>
    %cst_5 = arith.constant dense<0xFF800000> : vector<8xf32>
    %11 = vector.multi_reduction <maximumf>, %10, %cst_5 [1] : vector<8x8xf32> to vector<8xf32>
    %12 = vector.shape_cast %11 : vector<8xf32> to vector<8x1xf32>
    %13 = vector.broadcast %12 : vector<8x1xf32> to vector<8x8xf32>
    %14 = arith.subf %10, %13 : vector<8x8xf32>
    %15 = math.exp %14 : vector<8x8xf32>
    %cst_6 = arith.constant dense<0.000000e+00> : vector<8xf32>
    %16 = vector.multi_reduction <add>, %15, %cst_6 [1] : vector<8x8xf32> to vector<8xf32>
    %17 = vector.shape_cast %16 : vector<8xf32> to vector<8x1xf32>
    %cst_7 = arith.constant dense<0.000000e+00> : vector<8x8xf32>
    %18 = tpu.matmul %15, %9, %cst_7 {dimension_numbers = #tpu.dot_dimension_numbers<[1], [0], [0], [1], [0, 0, 1, 1], [], []>} : vector<8x8xf32>, vector<8x8xf32>, vector<8x8xf32> -> vector<8x8xf32>
    %19 = tpu.reciprocal %17 {approx = true} : vector<8x1xf32> -> vector<8x1xf32>
    %20 = vector.broadcast %19 : vector<8x1xf32> to vector<8x8xf32>
    %21 = arith.mulf %18, %20 : vector<8x8xf32>
    %22 = vector.extract_strided_slice %4 {offsets = [0, 8], sizes = [8, 8], strides = [1, 1]} : vector<8x32xf32> to vector<8x8xf32>
    %23 = vector.extract_strided_slice %5 {offsets = [0, 8], sizes = [8, 8], strides = [1, 1]} : vector<8x32xf32> to vector<8x8xf32>
    %24 = vector.extract_strided_slice %6 {offsets = [0, 8], sizes = [8, 8], strides = [1, 1]} : vector<8x32xf32> to vector<8x8xf32>
    %cst_8 = arith.constant dense<0.000000e+00> : vector<8x8xf32>
    %25 = tpu.matmul %22, %23, %cst_8 {dimension_numbers = #tpu.dot_dimension_numbers<[1], [1], [0], [0], [0, 0, 1, 0], [], []>} : vector<8x8xf32>, vector<8x8xf32>, vector<8x8xf32> -> vector<8x8xf32>
    %cst_9 = arith.constant dense<0xFF800000> : vector<8xf32>
    %26 = vector.multi_reduction <maximumf>, %25, %cst_9 [1] : vector<8x8xf32> to vector<8xf32>
    %27 = vector.shape_cast %26 : vector<8xf32> to vector<8x1xf32>
    %28 = vector.broadcast %27 : vector<8x1xf32> to vector<8x8xf32>
    %29 = arith.subf %25, %28 : vector<8x8xf32>
    %30 = math.exp %29 : vector<8x8xf32>
    %cst_10 = arith.constant dense<0.000000e+00> : vector<8xf32>
    %31 = vector.multi_reduction <add>, %30, %cst_10 [1] : vector<8x8xf32> to vector<8xf32>
    %32 = vector.shape_cast %31 : vector<8xf32> to vector<8x1xf32>
    %cst_11 = arith.constant dense<0.000000e+00> : vector<8x8xf32>
    %33 = tpu.matmul %30, %24, %cst_11 {dimension_numbers = #tpu.dot_dimension_numbers<[1], [0], [0], [1], [0, 0, 1, 1], [], []>} : vector<8x8xf32>, vector<8x8xf32>, vector<8x8xf32> -> vector<8x8xf32>
    %34 = tpu.reciprocal %32 {approx = true} : vector<8x1xf32> -> vector<8x1xf32>
    %35 = vector.broadcast %34 : vector<8x1xf32> to vector<8x8xf32>
    %36 = arith.mulf %33, %35 : vector<8x8xf32>
    %37 = vector.extract_strided_slice %4 {offsets = [0, 16], sizes = [8, 8], strides = [1, 1]} : vector<8x32xf32> to vector<8x8xf32>
    %38 = vector.extract_strided_slice %5 {offsets = [0, 16], sizes = [8, 8], strides = [1, 1]} : vector<8x32xf32> to vector<8x8xf32>
    %39 = vector.extract_strided_slice %6 {offsets = [0, 16], sizes = [8, 8], strides = [1, 1]} : vector<8x32xf32> to vector<8x8xf32>
    %cst_12 = arith.constant dense<0.000000e+00> : vector<8x8xf32>
    %40 = tpu.matmul %37, %38, %cst_12 {dimension_numbers = #tpu.dot_dimension_numbers<[1], [1], [0], [0], [0, 0, 1, 0], [], []>} : vector<8x8xf32>, vector<8x8xf32>, vector<8x8xf32> -> vector<8x8xf32>
    %cst_13 = arith.constant dense<0xFF800000> : vector<8xf32>
    %41 = vector.multi_reduction <maximumf>, %40, %cst_13 [1] : vector<8x8xf32> to vector<8xf32>
    %42 = vector.shape_cast %41 : vector<8xf32> to vector<8x1xf32>
    %43 = vector.broadcast %42 : vector<8x1xf32> to vector<8x8xf32>
    %44 = arith.subf %40, %43 : vector<8x8xf32>
    %45 = math.exp %44 : vector<8x8xf32>
    %cst_14 = arith.constant dense<0.000000e+00> : vector<8xf32>
    %46 = vector.multi_reduction <add>, %45, %cst_14 [1] : vector<8x8xf32> to vector<8xf32>
    %47 = vector.shape_cast %46 : vector<8xf32> to vector<8x1xf32>
    %cst_15 = arith.constant dense<0.000000e+00> : vector<8x8xf32>
    %48 = tpu.matmul %45, %39, %cst_15 {dimension_numbers = #tpu.dot_dimension_numbers<[1], [0], [0], [1], [0, 0, 1, 1], [], []>} : vector<8x8xf32>, vector<8x8xf32>, vector<8x8xf32> -> vector<8x8xf32>
    %49 = tpu.reciprocal %47 {approx = true} : vector<8x1xf32> -> vector<8x1xf32>
    %50 = vector.broadcast %49 : vector<8x1xf32> to vector<8x8xf32>
    %51 = arith.mulf %48, %50 : vector<8x8xf32>
    %52 = vector.extract_strided_slice %4 {offsets = [0, 24], sizes = [8, 8], strides = [1, 1]} : vector<8x32xf32> to vector<8x8xf32>
    %53 = vector.extract_strided_slice %5 {offsets = [0, 24], sizes = [8, 8], strides = [1, 1]} : vector<8x32xf32> to vector<8x8xf32>
    %54 = vector.extract_strided_slice %6 {offsets = [0, 24], sizes = [8, 8], strides = [1, 1]} : vector<8x32xf32> to vector<8x8xf32>
    %cst_16 = arith.constant dense<0.000000e+00> : vector<8x8xf32>
    %55 = tpu.matmul %52, %53, %cst_16 {dimension_numbers = #tpu.dot_dimension_numbers<[1], [1], [0], [0], [0, 0, 1, 0], [], []>} : vector<8x8xf32>, vector<8x8xf32>, vector<8x8xf32> -> vector<8x8xf32>
    %cst_17 = arith.constant dense<0xFF800000> : vector<8xf32>
    %56 = vector.multi_reduction <maximumf>, %55, %cst_17 [1] : vector<8x8xf32> to vector<8xf32>
    %57 = vector.shape_cast %56 : vector<8xf32> to vector<8x1xf32>
    %58 = vector.broadcast %57 : vector<8x1xf32> to vector<8x8xf32>
    %59 = arith.subf %55, %58 : vector<8x8xf32>
    %60 = math.exp %59 : vector<8x8xf32>
    %cst_18 = arith.constant dense<0.000000e+00> : vector<8xf32>
    %61 = vector.multi_reduction <add>, %60, %cst_18 [1] : vector<8x8xf32> to vector<8xf32>
    %62 = vector.shape_cast %61 : vector<8xf32> to vector<8x1xf32>
    %cst_19 = arith.constant dense<0.000000e+00> : vector<8x8xf32>
    %63 = tpu.matmul %60, %54, %cst_19 {dimension_numbers = #tpu.dot_dimension_numbers<[1], [0], [0], [1], [0, 0, 1, 1], [], []>} : vector<8x8xf32>, vector<8x8xf32>, vector<8x8xf32> -> vector<8x8xf32>
    %64 = tpu.reciprocal %62 {approx = true} : vector<8x1xf32> -> vector<8x1xf32>
    %65 = vector.broadcast %64 : vector<8x1xf32> to vector<8x8xf32>
    %66 = arith.mulf %63, %65 : vector<8x8xf32>
    %67 = tpu.concatenate %21, %36, %51, %66 in 1 : vector<8x8xf32>, vector<8x8xf32>, vector<8x8xf32>, vector<8x8xf32> -> vector<8x32xf32>
    %c0_20 = arith.constant 0 : index
    %c0_21 = arith.constant 0 : index
    %c0_22 = arith.constant 0 : index
    %68 = vector.load %arg3[%c0_20, %c0_21, %c0_22] : memref<1x8x32xf32, #tpu.memory_space<vmem>>, vector<1x8x32xf32>
    %69 = vector.shape_cast %68 : vector<1x8x32xf32> to vector<8x32xf32>
    %70 = vector.shape_cast %67 : vector<8x32xf32> to vector<1x8x32xf32>
    tpu.vector_store %arg3[%c0_20, %c0_21, %c0_22], %70 {strides = array<i32>} : memref<1x8x32xf32, #tpu.memory_space<vmem>>, vector<1x8x32xf32>,
    return
  }
  func.func @transform_0(%arg0: i32) -> (i32, i32, i32) {
    %c0_i32 = arith.constant 0 : i32
    %c0_i32_0 = arith.constant 0 : i32
    %c0_i32_1 = arith.constant 0 : i32
    return %arg0, %c0_i32, %c0_i32_0 : i32, i32, i32
  }
  func.func @transform_1(%arg0: i32) -> (i32, i32) {
    %c0_i32 = arith.constant 0 : i32
    %c0_i32_0 = arith.constant 0 : i32
    %c0_i32_1 = arith.constant 0 : i32
    return %c0_i32, %c0_i32_0 : i32, i32
  }
  func.func @transform_2(%arg0: i32) -> (i32, i32, i32) {
    %c0_i32 = arith.constant 0 : i32
    %c0_i32_0 = arith.constant 0 : i32
    %c0_i32_1 = arith.constant 0 : i32
    return %arg0, %c0_i32, %c0_i32_0 : i32, i32, i32
  }
}

</mosaic_0001>

<bundles_post_ra>
// kernel: tpu_custom_call.1
= control target key start
LH: loop header
LB: loop body
LE: loop exit
PB: predicated region body
PF: predicated region fallthrough
CT: control target
= control target key end

     0   :  { %7 = vsyncpa [#allocation3], 0  ;;  %s1638_s0 = inlined_call_operand.hbm [shape: f32[2,8,32], index: 0, kind: input, shape index: {}]   ;;  %s1639_s1 = inlined_call_operand.hbm [shape: f32[32,96], index: 1, kind: input, shape index: {}]   ;;  %s1640_s2 = inlined_call_operand.hbm [shape: f32[2,8,32], index: 2, kind: output, shape index: {}]  }
   0x1   :  { %9 = vsyncpa [#allocation3 + $0x1], 0 }
   0x2   :  { %10 = vsyncpa [#allocation6], 0 }
   0x3   :  { %11 = vsyncpa [#allocation4], 0 }
   0x4   :  { %13 = vsyncpa [#allocation4 + $0x1], 0  ;;  %s1389_s9 = smov 0   ;;  %s1391_s10 = smov 0  }
   0x5   :  { %s1393_s11 = smov 0   ;;  %s1395_s12 = smov 0  }
   0x6 LB: > { %s1410_s13 = sadd.s32 4294967295, %s1350_s12   ;;  %s1025_s14 = sadd.s32 4294967294, %s1350_s12   ;;  %s1350_s12 = sphi %s1395_s12, %s1660_s12   ;;  %s1346_s11 = sphi %s1393_s11, %s1659_s11   ;;  %s1342_s10 = sphi %s1391_s10, %s1658_s10   ;;  %s1338_s9 = sphi %s1389_s9, %s1657_s9  }
   0x7   : > { %p39_p0 = scmp.ne.s32.totalorder %s1342_s10, %s1338_s9  ;;  %p1641_p1 = scmp.eq.s32.totalorder %s1410_s13, 0 }
   0x8   : > { %p90_p3 = scmp.eq.s32.totalorder %s1025_s14, 1  ;;  %p1026_p5 = scmp.ge.s32.totalorder %s1350_s12, 1 }
   0x9   : > { %p1419_p4 = por %p1641_p1, %p39_p0  ;;  %p97_p7 = scmp.lt.s32.totalorder %s1350_s12, 3 }
   0xa   : > { %p1424_p6 = por %p90_p3, %p39_p0  ;;  %s1352_s18 = smov [#allocation5]  }
   0xb   : > { %s1644_s15 = scalar_select %p1419_p4, 1, 0 }
   0xc   : > { %s1645_s16 = scalar_select %p1424_p6, 1, 0 }
   0xd   : > { %p1429_p8 = pnand %p1026_p5, %p97_p7  ;;  %s109_s19 = sshll.u32 %s1352_s18, 4  ;;  %s1433_s19 = int_to_ptr.vmem [resolvable:$true] %s109_s19 }
   0xe   : > { %s1445_s21 = sadd.s32 1, %s1350_s12   ;;  %s26_s22 = sadd.s32 1, %s1346_s11 }
   0xf   : > { %s1646_s17 = scalar_select %p1429_p8, 1, 0 }
  0x10   : > { %p1138_p9 = pneg %p1429_p8  ;;  %s23_s23 = ssub.s32 %s1350_s12, %s1445_s21 }
  0x11   : > { %s1222_s26 = scalar_lea.hbm %s1639_s1, 512 }
  0x12   : > { %p1440_p11 = pnand %p1138_p9, %p1641_p1  ;;  %p1223_p12 = scmp.ne.s32.totalorder %s1639_s1, %s1222_s26 }
  0x13   : > { %p1229_p5 = scmp.lt.u32.totalorder %s1222_s26, %s1639_s1 }
  0x14   : > { %p1224_p13 = pneg %p1440_p11 }
  0x16   : > { %p1225_p0 = pnand %p1224_p13, %p1223_p12 }
  0x18   : > { %p1226_p3 = pneg %p1225_p0 }
  0x1a   : > { %p1231_p7 = pnand %p1229_p5, %p1226_p3 }
  0x1c   : > { %1234 = shalt.err (!%p1231_p7)
}
  0x1d   : > { %s1235_s3 = scalar_lea.vmem %s1433_s19, 512  ;;  %p1243_p2 = scmp.lt.s32.totalorder %s1433_s19, %s1433_s19 }
  0x1e   : > { %p1236_p9 = scmp.ne.s32.totalorder %s1433_s19, %s1235_s3  ;;  %p1244_p6 = scmp.lt.s32.totalorder %s1235_s3, %s1235_s3 }
  0x20   : > { %p1238_p10 = pnand %p1236_p9, %p1224_p13  ;;  %p1245_p4 = por %p1244_p6, %p1243_p2 }
  0x22   : > { %p1239_p1 = pneg %p1238_p10 }
  0x24   : > { %p1246_p8 = pnand %p1245_p4, %p1239_p1 }
  0x26   : > { %1249 = shalt.err (!%p1246_p8)
}
  0x27   : > { %s1353_s4 = smov 128   ;;  %s1354_s5 = smov 8  }
  0x28   : > { %1141 = dma.hbm_to_vmem [thread:$0]  (!%p1440_p11), %s1639_s1, 512, %s1433_s19, [#allocation6], %s1353_s4, %s1353_s4, %s1354_s5  }
  0x29   : > { %p24_p2 = scmp.eq.s32.totalorder %s23_s23, 0  ;;  %p33_p1 = scmp.ne.s32.totalorder %s1346_s11, %s1342_s10 }
  0x2a   : > { %p34_p4 = scmp.eq.s32.totalorder %s1350_s12, 0  ;;  %p1151_p6 = scmp.lt.s32.totalorder %s1350_s12, 2 }
  0x2b   : > { %s1476_s8 = scalar_select %p24_p2, %s1346_s11, %s26_s22  }
  0x2c   : > { %p35_p8 = por %p34_p4, %p33_p1  ;;  %p1648_p10 = scmp.eq.s32.totalorder %s1410_s13, 1 }
  0x2d   : > { %s123_s18 = sand.u32 1, %s1346_s11   ;;  %s1030_s24 = sshll.u32 %s1350_s12, 7 }
  0x2e   : > { %p1480_p12 = por %p1648_p10, %p33_p1  ;;  %s1029_s25 = sshll.u32 %s123_s18, 3 }
  0x2f   : > { %s1489_s27 = scalar_lea.hbm %s1638_s0, %s1030_s24  ;;  %s127_s19 = scalar_lea.vmem [#allocation2], %s1029_s25 }
  0x30   : > { %s134_s22 = sshll.u32 %s127_s19, 4  ;;  %p1491_p11 = pnand %p1151_p6, %p35_p8  ;;  %s1495_s22 = int_to_ptr.vmem [resolvable:$true] %s134_s22 }
  0x31   : > { %s124_s28 = scalar_lea.sflag [#allocation3], %s123_s18  ;;  %s1250_s29 = scalar_lea.hbm %s1489_s27, 128 }
  0x32   : > { %p1251_p13 = scmp.ne.s32.totalorder %s1489_s27, %s1250_s29  ;;  %p1252_p0 = pneg %p1491_p11 }
  0x33   : > { %s1255_s4 = scalar_lea.hbm %s1638_s0, 256  ;;  %p1256_p7 = scmp.lt.u32.totalorder %s1489_s27, %s1638_s0 }
  0x34   : > { %p1253_p3 = pnand %p1252_p0, %p1251_p13  ;;  %p1257_p9 = scmp.lt.u32.totalorder %s1255_s4, %s1250_s29 }
  0x35   : > { %p1259_p1 = scmp.lt.u32.totalorder %s1250_s29, %s1489_s27 }
  0x36   : > { %p1254_p5 = pneg %p1253_p3  ;;  %p1258_p2 = por %p1257_p9, %p1256_p7 }
  0x38   : > { %p1260_p4 = por %p1259_p1, %p1258_p2 }
  0x3a   : > { %p1261_p6 = pnand %p1260_p4, %p1254_p5 }
  0x3c   : > { %1264 = shalt.err (!%p1261_p6)
}
  0x3d   : > { %s1265_s7 = scalar_lea.vmem %s1495_s22, 128  ;;  %s1355_s18 = smov [#allocation2]  }
  0x3e   : > { %p1266_p8 = scmp.ne.s32.totalorder %s1495_s22, %s1265_s7  ;;  %s1270_s24 = sshll.u32 %s1355_s18, 4  ;;  %s1271_s24 = int_to_ptr.vmem [resolvable:$false] %s1270_s24 }
  0x3f   : > { %s1272_s25 = scalar_lea.vmem %s1271_s24, 256  ;;  %p1273_p3 = scmp.lt.s32.totalorder %s1495_s22, %s1271_s24 }
  0x40   : > { %p1268_p10 = pnand %p1266_p8, %p1252_p0  ;;  %p1274_p7 = scmp.lt.s32.totalorder %s1272_s25, %s1265_s7 }
  0x42   : > { %p1269_p13 = pneg %p1268_p10  ;;  %p1275_p9 = por %p1274_p7, %p1273_p3 }
  0x44   : > { %p1276_p2 = pnand %p1275_p9, %p1269_p13 }
  0x46   : > { %1279 = shalt.err (!%p1276_p2)
}
  0x47   : > { %1145 = dma.hbm_to_vmem [thread:$0]  (!%p1491_p11), %s1489_s27, 128, %s1495_s22, %s124_s28  }
  0x48   : > { %p1651_p5 = scmp.ne.s32.totalorder %s1646_s17, 0 }
  0x49   : > { %s1525_s20 = sand.u32 (!%p1651_p5), 1, %s1342_s10   ;;  %p1652_p0 = scmp.ne.s32.totalorder (!%p1651_p5), %s1644_s15, 0 }
  0x4a   : > { %143 = sbr.rel (%p1651_p5) target bundleno = 1192 (0x4a8), region = 28  ;;  %s1032_s26 = sshll.u32 (!%p1651_p5), %s1525_s20, 3 }
  0x4b   : > { %s146_s19 = scalar_lea.sflag (!%p1651_p5), [#allocation3], %s1525_s20  ;;  %s149_s29 = scalar_lea.vmem (!%p1651_p5), [#allocation2], %s1032_s26 }
  0x51   : > { %1325 = dma.done.wait (%p1652_p0), %s146_s19, 128  }
  0x52   : > { %1327 = vsyncadd (%p1652_p0), %s146_s19, 4294967168  ;;  %p1653_p11 = scmp.eq.s32.totalorder %s1410_s13, 0 }
  0x54   : > { %1329 = dma.done.wait (%p1653_p11), [#allocation6], 512   ;;  %p1654_p1 = pmov %p1653_p11 }
  0x55   : > { %v1356_v0 = vmov 0.0|0.0   ;;  %vm1357_vm0 = vmmov 0   ;;  %v1358_v1 = vmov 0.0   ;;  %v175_v2 = vld [vmem:[#allocation5] sm:$0xff]  ;;  %v176_v3 = vld [vmem:[#allocation5 + $0x8] sm:$0xff]  ;;  %v177_v4 = vld [vmem:[#allocation5 + $0x10] sm:$0xff] }
  0x56   : > { %1331 = vsyncadd (%p1654_p1), [#allocation6], 4294966784  ;;  %1124 = vmatprep.subr.bf16.mxu0 %v1356_v0  ;;  %1081 = vmatprep.mubr.msk.f32.mxu0 %vm1357_vm0, %v1358_v1  ;;  %v1125_v5 = vpack.c.bf16 %v176_v3, %v175_v2  ;;  %v178_v6 = vld [vmem:[#allocation5 + $0x18] sm:$0xff]  ;;  %vm179_vm1 = vcmask 261120   ;;  %s1359_s15 = smov 120   ;;  %s1360_s17 = smov 96  }
  0x57   : > { %1084 = vmatprep.subr.mxu1 %v1358_v1  ;;  %1086 = vmatprep.mubr.msk.f32.mxu1 %vm1357_vm0, %v1358_v1  ;;  %v1128_v7 = vpack.c.bf16 %v178_v6, %v177_v4  ;;  %v174_v8 = vld [vmem:[%s149_s29] sm:$0xff]  ;;  %s1361_s27 = smov 80   ;;  %s1362_s22 = smov 88   ;;  %vm256_vm2 = vcmask 64512   ;;  %vm926_vm3 = vcmask 130048   ;;  %vm928_vm4 = vcmask 195584  }
  0x58   : > { %1126 = vmatpush3.bf16.msra.mxu0 %v1125_v5  ;;  %s1363_s23 = smov 72   ;;  %s1364_s28 = smov 112  }
  0x59   : > { %1127 = vmatprep.subr.bf16.mxu0 %v1356_v0  ;;  %s1365_s30 = smov 104   ;;  %s1366_s3 = smov 56  }
  0x5a   : > { %s1367_s4 = smov 64   ;;  %s1368_s5 = smov 40  }
  0x5b   : > { %s1369_s6 = smov 48   ;;  %s1370_s7 = smov 8  }
  0x5c   : > { %1129 = vmatpush3.bf16.msra.mxu0 %v1128_v7  ;;  %s1371_s18 = smov 16   ;;  %s1372_s24 = smov 24  }
  0x5d   : > { %1094 = vmatprep.subr.mxu0 %v1358_v1  ;;  %s1049_s25 = sshll.u32 %s1410_s13, 7  ;;  %s173_s19 = scalar_lea.vmem [#allocation7], %s1032_s26 }
  0x5e   : > { %s945_s29 = sshll.u32 %s173_s19, 4  ;;  %s932_s13 = scalar_lea.sflag [#allocation4], %s1525_s20  ;;  %s1595_s29 = int_to_ptr.vmem [resolvable:$true] %s945_s29 }
  0x5f   : > { %1082 = vmatmul.mubr.msk.f32.vlgmr.msra.gmra.mrb[0].mxu0 %vm179_vm1, %v174_v8  ;;  %s1280_s26 = scalar_lea.vmem %s1595_s29, 128 }
  0x60   : > { %1096 = vmatprep.mubr.msk.f32.mxu0 %vm1357_vm0, %v1358_v1  ;;  %p1281_p4 = scmp.ne.s32.totalorder %s1595_s29, %s1280_s26 }
  0x62   : > { %p1282_p6 = pnand %p1281_p4, %p1480_p12 }
  0x64   : > { %p1283_p8 = pneg %p1282_p6 }
 0x132   : > { %v249_v9 = vpop.f32.mrb[0].mxu0 }
 0x133   : > { %418 = vrot.lane.b32.xlu1 %v249_v9, %s1359_s15  ;;  %254 = vrot.lane.b32.xlu0 %v249_v9, %s1360_s17  ;;  %v1083_v10 = vpop.f32.mrb[1].mxu0 }
 0x137   : > { %585 = vrot.lane.b32.xlu1 %v249_v9, %s1361_s27  ;;  %420 = vrot.lane.b32.xlu0 %v249_v9, %s1362_s22  ;;  %s1593_s27 = scalar_lea.hbm %s1640_s2, %s1049_s25  ;;  %s1373_s22 = smov [#allocation7]  }
 0x13b   : > { %750 = vrot.lane.b32.xlu1 %v249_v9, %s1363_s23  ;;  %583 = vrot.lane.b32.xlu0 %v249_v9, %s1364_s28  ;;  %s1284_s23 = sshll.u32 %s1373_s22, 4  ;;  %s1285_s23 = int_to_ptr.vmem [resolvable:$false] %s1284_s23 }
 0x13c   : > { %s1286_s28 = scalar_lea.vmem %s1285_s23, 256  ;;  %p1287_p10 = scmp.lt.s32.totalorder %s1595_s29, %s1285_s23 }
 0x13d   : > { %p1288_p13 = scmp.lt.s32.totalorder %s1286_s28, %s1280_s26 }
 0x13f   : > { %748 = vrot.lane.b32.xlu0 %v249_v9, %s1365_s30  ;;  %p1289_p3 = por %p1288_p13, %p1287_p10 }
 0x141   : > { %p1290_p7 = pnand %p1289_p3, %p1283_p8 }
 0x1a5   : > { %v419_v11 = vpop.permute.xlu1 %418  ;;  %v255_v12 = vpop.permute.xlu0 %254 }
 0x1a6   : > { %1085 = vmatpush3.xpose.msk.msra.mxu1 %vm256_vm2, %v255_v12 }
 0x1a7   : > { %1089 = vmatprep.subr.mxu1 %v1358_v1 }
 0x1a9   : > { %1087 = vmatmul.mubr.msk.f32.vlgmr.msra.gmra.mrb[0].mxu1 %vm256_vm2, %v249_v9  ;;  %v421_v13 = vpop.permute.xlu0 %420  ;;  %v586_v14 = vpop.permute.xlu1 %585 }
 0x1aa   : > { %1095 = vmatpush3.xpose.msk.msra.mxu0 %vm256_vm2, %v421_v13  ;;  %1091 = vmatprep.mubr.msk.f32.mxu1 %vm1357_vm0, %v1358_v1 }
 0x1ab   : > { %1104 = vmatprep.subr.mxu0 %v1358_v1 }
 0x1ad   : > { %1097 = vmatmul.mubr.msk.f32.vlgmr.msra.gmra.mrb[2].mxu0 %vm256_vm2, %v419_v11  ;;  %v584_v15 = vpop.permute.xlu0 %583  ;;  %v751_v16 = vpop.permute.xlu1 %750 }
 0x1ae   : > { %1105 = vmatpush3.xpose.msk.msra.mxu0 %vm256_vm2, %v586_v14  ;;  %1106 = vmatprep.mubr.msk.f32.mxu0 %vm1357_vm0, %v1358_v1 }
 0x1af   : > { %1114 = vmatprep.subr.mxu0 %v1358_v1 }
 0x1b1   : > { %1107 = vmatmul.mubr.msk.f32.vlgmr.msra.gmra.mrb[4].mxu0 %vm256_vm2, %v584_v15  ;;  %v749_v17 = vpop.permute.xlu0 %748 }
 0x1b2   : > { %1115 = vmatpush3.xpose.msk.msra.mxu0 %vm256_vm2, %v751_v16  ;;  %1116 = vmatprep.mubr.msk.f32.mxu0 %vm1357_vm0, %v1358_v1 }
 0x1b5   : > { %1117 = vmatmul.mubr.msk.f32.vlgmr.msra.gmra.mrb[6].mxu0 %vm256_vm2, %v749_v17 }
 0x27c   : > { %v327_v18 = vpop.f32.mrb[0].mxu1 }
 0x27d   : > { %v1088_v19 = vpop.f32.mrb[1].mxu1  ;;  %v331_v20 = vsel %vm256_vm2, %v327_v18, -inf }
 0x27e   : > { %332 = vmax.xlane.f32.xlu1 %v331_v20 }
 0x280   : > { %v492_v21 = vpop.f32.mrb[2].mxu0 }
 0x281   : > { %v1098_v22 = vpop.f32.mrb[3].mxu0  ;;  %v496_v23 = vsel %vm256_vm2, %v492_v21, -inf }
 0x282   : > { %497 = vmax.xlane.f32.xlu0 %v496_v23 }
 0x284   : > { %v657_v24 = vpop.f32.mrb[4].mxu0 }
 0x285   : > { %v1108_v25 = vpop.f32.mrb[5].mxu0  ;;  %v661_v26 = vsel %vm256_vm2, %v657_v24, -inf }
 0x286   : > { %662 = vmax.xlane.f32.xlu0 %v661_v26 }
 0x288   : > { %v822_v27 = vpop.f32.mrb[6].mxu0 }
 0x289   : > { %v1118_v28 = vpop.f32.mrb[7].mxu0  ;;  %v826_v29 = vsel %vm256_vm2, %v822_v27, -inf }
 0x28f   : > { %505 = vrot.lane.b32.xlu1 %v249_v9, %s1366_s3 }
 0x29c   : > { %340 = vrot.lane.b32.xlu0 %v249_v9, %s1367_s4 }
 0x2a0   : > { %835 = vrot.lane.b32.xlu0 %v249_v9, %s1368_s5 }
 0x2b3   : > { %827 = vmax.xlane.f32.xlu1 %v826_v29 }
 0x2c4   : > { %670 = vrot.lane.b32.xlu1 %v249_v9, %s1369_s6 }
 0x30b   : > { %v333_v30 = vpop.xlane.xlu1 %332 }
 0x30c   : > { %v334_v31 = vsub.f32 %v327_v18, %v333_v30 }
 0x30e   : > { %v335_v32 = vmul.f32 1.442695, %v334_v31 }
 0x30f   : > { %v498_v33 = vpop.xlane.xlu0 %497  ;;  %v506_v41 = vpop.permute.xlu1 %505 }
 0x310   : > { %1206 = vpow2.f32 %v335_v32  ;;  %v499_v34 = vsub.f32 %v492_v21, %v498_v33 }
 0x312   : > { %v500_v35 = vmul.f32 1.442695, %v499_v34 }
 0x313   : > { %v663_v36 = vpop.xlane.xlu0 %662 }
 0x314   : > { %1208 = vpow2.f32 %v500_v35  ;;  %v664_v37 = vsub.f32 %v657_v24, %v663_v36 }
 0x316   : > { %v665_v38 = vmul.f32 1.442695, %v664_v37 }
 0x317   : > { %v341_v39 = vpop.permute.xlu0 %340 }
 0x318   : > { %1210 = vpow2.f32 %v665_v38  ;;  %1090 = vmatpush3.msra.mxu1 %v341_v39 }
 0x319   : > { %1099 = vmatprep.subr.mxu1 %v1358_v1 }
 0x31a   : > { %v1207_v40 = vpop.eup %1206 }
 0x31b   : > { %1092 = vmatmul.mubr.msk.f32.vlgmr.msra.gmra.mrb[2].mxu1 %vm256_vm2, %v1207_v40  ;;  %v337_v46 = vsel %vm256_vm2, %v1207_v40, 0.0  ;;  %v836_v51 = vpop.permute.xlu0 %835 }
 0x31c   : > { %1100 = vmatpush3.msra.mxu1 %v506_v41  ;;  %1101 = vmatprep.mubr.msk.f32.mxu1 %vm1357_vm0, %v1358_v1 }
 0x31d   : > { %1109 = vmatprep.subr.mxu1 %v1358_v1 }
 0x31e   : > { %v1209_v42 = vpop.eup %1208 }
 0x31f   : > { %1102 = vmatmul.mubr.msk.f32.vlgmr.msra.gmra.mrb[4].mxu1 %vm256_vm2, %v1209_v42  ;;  %v502_v43 = vsel %vm256_vm2, %v1209_v42, 0.0 }
 0x320   : > { %503 = vadd.xlane.f32.xlu1 %v502_v43  ;;  %1111 = vmatprep.mubr.msk.f32.mxu1 %vm1357_vm0, %v1358_v1 }
 0x322   : > { %v1211_v44 = vpop.eup %1210 }
 0x323   : > { %v667_v45 = vsel %vm256_vm2, %v1211_v44, 0.0 }
 0x324   : > { %668 = vadd.xlane.f32.xlu0 %v667_v45  ;;  %338 = vadd.xlane.f32.xlu1 %v337_v46 }
 0x340   : > { %v828_v47 = vpop.xlane.xlu1 %827 }
 0x341   : > { %v829_v48 = vsub.f32 %v822_v27, %v828_v47 }
 0x343   : > { %v830_v49 = vmul.f32 1.442695, %v829_v48 }
 0x344   : > { %v671_v50 = vpop.permute.xlu1 %670 }
 0x345   : > { %1212 = vpow2.f32 %v830_v49  ;;  %1110 = vmatpush3.msra.mxu1 %v671_v50 }
 0x346   : > { %1112 = vmatmul.mubr.msk.f32.vlgmr.msra.gmra.mrb[6].mxu1 %vm256_vm2, %v1211_v44  ;;  %1119 = vmatprep.subr.mxu1 %v1358_v1 }
 0x347   : > { %1120 = vmatpush3.msra.mxu1 %v836_v51  ;;  %1121 = vmatprep.mubr.msk.f32.mxu1 %vm1357_vm0, %v1358_v1 }
 0x34f   : > { %v1213_v52 = vpop.eup %1212 }
 0x350   : > { %1122 = vmatmul.mubr.msk.f32.vlgmr.msra.gmra.mrb[8].mxu1 %vm256_vm2, %v1213_v52  ;;  %v832_v53 = vsel %vm256_vm2, %v1213_v52, 0.0 }
 0x351   : > { %833 = vadd.xlane.f32.xlu0 %v832_v53 }
 0x3ad   : > { %v504_v54 = vpop.xlane.xlu1 %503 }
 0x3ae   : > { %1214 = vrcp.f32 %v504_v54 }
 0x3b1   : > { %v669_v61 = vpop.xlane.xlu0 %668  ;;  %v339_v7 = vpop.xlane.xlu1 %338 }
 0x3b2   : > { %1216 = vrcp.f32 %v669_v61 }
 0x3b8   : > { %v1215_v57 = vpop.eup %1214 }
 0x3bc   : > { %v1217_v63 = vpop.eup %1216 }
 0x3de   : > { %v834_v62 = vpop.xlane.xlu0 %833 }
 0x3df   : > { %1218 = vrcp.f32 %v834_v62 }
 0x3e0   : > { %1220 = vrcp.f32 %v339_v7 }
 0x3e9   : > { %v1219_v3 = vpop.eup %1218 }
 0x3ea   : > { %v1221_v8 = vpop.eup %1220 }
 0x3ee   : > { %v412_v55 = vpop.f32.mrb[2].mxu1 }
 0x3ef   : > { %v1093_v56 = vpop.f32.mrb[3].mxu1  ;;  %v417_v11 = vmul.f32 %v1221_v8, %v412_v55 }
 0x3f2   : > { %v577_v58 = vpop.f32.mrb[4].mxu1 }
 0x3f3   : > { %v582_v59 = vmul.f32 %v1215_v57, %v577_v58  ;;  %v1103_v60 = vpop.f32.mrb[5].mxu1 }
 0x3f5   : > { %914 = vrot.lane.b32.xlu0 %v582_v59, %s1370_s7 }
 0x419   : > { %v742_v0 = vpop.f32.mrb[6].mxu1 }
 0x41a   : > { %v747_v1 = vmul.f32 %v1217_v63, %v742_v0  ;;  %v1113_v2 = vpop.f32.mrb[7].mxu1 }
 0x41c   : > { %918 = vrot.lane.b32.xlu1 %v747_v1, %s1371_s18 }
 0x423   : > { %v907_v4 = vpop.f32.mrb[8].mxu1 }
 0x424   : > { %v912_v5 = vmul.f32 %v1219_v3, %v907_v4  ;;  %v1123_v6 = vpop.f32.mrb[9].mxu1 }
 0x426   : > { %922 = vrot.lane.b32.xlu1 %v912_v5, %s1372_s24 }
 0x467   : > { %v915_v9 = vpop.permute.xlu0 %914 }
 0x468   : > { %v925_v12 = vsel %vm256_vm2, %v417_v11, %v915_v9 }
 0x48e   : > { %v919_v10 = vpop.permute.xlu1 %918 }
 0x48f   : > { %v927_v13 = vsel %vm926_vm3, %v925_v12, %v919_v10 }
 0x498   : > { %v923_v14 = vpop.permute.xlu1 %922 }
 0x499   : > { %v929_v15 = vsel %vm928_vm4, %v927_v13, %v923_v14 }
 0x49a   : > { %930 = vst.msk [vmem:[%s173_s19] sm:$0xff] %vm179_vm1, %v929_v15 }
 0x49b   : > { %1293 = shalt.err (!%p1290_p7)
}
 0x49c   : > { %s1294_s20 = scalar_lea.hbm %s1593_s27, 128  ;;  %s1298_s4 = scalar_lea.hbm %s1640_s2, 256 }
 0x49d   : > { %p1295_p9 = scmp.ne.s32.totalorder %s1593_s27, %s1294_s20  ;;  %p1299_p0 = scmp.lt.u32.totalorder %s1593_s27, %s1640_s2 }
 0x49e   : > { %p1300_p11 = scmp.lt.u32.totalorder %s1298_s4, %s1294_s20  ;;  %p1302_p4 = scmp.lt.u32.totalorder %s1294_s20, %s1593_s27 }
 0x49f   : > { %p1296_p2 = pnand %p1295_p9, %p1480_p12 }
 0x4a0   : > { %p1301_p1 = por %p1300_p11, %p1299_p0 }
 0x4a1   : > { %p1297_p5 = pneg %p1296_p2 }
 0x4a2   : > { %p1303_p6 = por %p1302_p4, %p1301_p1 }
 0x4a4   : > { %p1304_p8 = pnand %p1303_p6, %p1297_p5 }
 0x4a6   : > { %1307 = shalt.err (!%p1304_p8)
}
 0x4a7   : > { %1136 = dma.vmem_to_hbm [thread:$0]  (%p1480_p12), %s1595_s29, 128, %s1593_s27, %s932_s13  }
 0x4a8 PF: > { %s957_s7 = sand.u32 1, %s1338_s9   ;;  %p1655_p10 = scmp.ne.s32.totalorder %s1645_s16, 0 }
 0x4a9   : > { %p1656_p13 = scmp.ge.s32.totalorder %s1350_s12, 2  ;;  %s958_s18 = scalar_lea.sflag [#allocation4], %s957_s7 }
 0x4ab   : > { %p1147_p3 = pnand %p1656_p13, %p1655_p10 }
 0x4ad   : > { %1333 = dma.done.wait (!%p1147_p3), %s958_s18, 128  }
 0x4ae   : > { %1335 = vsyncadd (!%p1147_p3), %s958_s18, 4294967168  ;;  %p16_p7 = scmp.ge.s32.totalorder %s1445_s21, 4   ;;  %s1657_s9 = smov %s1342_s10 }
 0x4af   : > { %s1658_s10 = smov %s1346_s11  ;;  %s1659_s11 = smov %s1476_s8 }
 0x4b0   : > { %s1660_s12 = smov %s1445_s21  ;;  %18 = sbr.rel (!%p16_p7) target bundleno = 6 (0x6), region = 77 }
 0x4b7   :  { %963 = vsyncpa [#allocation3], 1 }
 0x4b8   :  { %965 = vsyncpa [#allocation3 + $0x1], 1 }
 0x4b9   :  { %966 = vsyncpa [#allocation6], 1 }
 0x4ba   :  { %967 = vsyncpa [#allocation4], 1 }
 0x4bb   :  { %969 = vsyncpa [#allocation4 + $0x1], 1 }

</bundles_post_ra>
